<compile_context>
chip_gen: v6e
topology: v6e:2x2x1
jax: 0.10.0
libtpu: 0.0.40
codegen_flags: <defaults>
</compile_context>

<pallas_src>
import functools

import jax
import jax.numpy as jnp
import numpy as np
from jax.experimental import pallas as pl
from jax.experimental.pallas import tpu as pltpu


def _stat_pool_kernel(x_ref, out_ref, *, tc_chunk):
    # x_ref:   (Bb, T, D) block of the input
    # out_ref: (Bb, 2, D) block of the output: [:, 0, :] = mean, [:, 1, :] = std
    bb, t, d = x_ref.shape
    inv_t = 1.0 / t
    inv_tm1 = 1.0 / (t - 1)

    # Pass 1: streaming sum over T (chunked so the f32 upcast stays chunk-sized).
    acc = jnp.zeros((bb, d), jnp.float32)
    start = 0
    while start < t:
        c = min(tc_chunk, t - start)
        xc = x_ref[:, start:start + c, :].astype(jnp.float32)   # (Bb, c, D)
        acc = acc + jnp.sum(xc, axis=1)
        start += c
    mean = acc * inv_t                                           # (Bb, D)

    # Pass 2: streaming centered sum-of-squares (numerically stable two-pass).
    acc2 = jnp.zeros((bb, d), jnp.float32)
    start = 0
    while start < t:
        c = min(tc_chunk, t - start)
        xc = x_ref[:, start:start + c, :].astype(jnp.float32)   # (Bb, c, D)
        cen = xc - mean[:, None, :]
        acc2 = acc2 + jnp.sum(cen * cen, axis=1)
        start += c
    std = jnp.sqrt(acc2 * inv_tm1)                               # (Bb, D) ddof=1

    # cat([mean, std], dim=1): two full-lane-width stores into the (Bb, 2, D)
    # output tile (wrapper reshapes to (B, 2*D)).
    out_ref[:, 0, :] = mean.astype(out_ref.dtype)
    out_ref[:, 1, :] = std.astype(out_ref.dtype)


def _physical_vmem_bytes():
    try:
        return int(pltpu.get_tpu_info().vmem_capacity_bytes)
    except Exception:
        return 64 * 1024 * 1024      # most conservative: v7x per-TensorCore


def _pick_block_b(B, T, D, itemsize, tc_chunk, phys_vmem):
    """Pick the batch block size.

    Constraints:
      * 2 x (double-buffered) input block + f32 chunk temps + output block
        fits in ~60% of physical VMEM (generation-aware via phys_vmem).
      * single input-block DMA targets <= ~16 MiB.
      * prefer >= 4 grid steps (>= 2 blocks per TensorCore on v7x, better
        pipelining everywhere) when B is large enough.
    """
    vmem_cap = int(0.6 * phys_vmem)
    target_block_bytes = 16 * 1024 * 1024

    per_row_in = T * D * itemsize                      # one batch row of input
    per_row_extra = 3 * tc_chunk * D * 4 + 2 * 2 * D * 4   # f32 chunk temps + out dbl-buf

    bb_cap = min(vmem_cap // (2 * per_row_in + per_row_extra),
                 target_block_bytes // max(per_row_in, 1))
    bb_cap = max(1, int(bb_cap))

    if B >= 4:
        bb = min(bb_cap, max(1, B // 4))               # keep >= 4 grid steps
    else:
        bb = min(bb_cap, B)
    bb = max(1, min(bb, B))
    if bb >= 8:
        bb = (bb // 8) * 8                             # sublane-friendly DMA
    return bb


def statistical_pooling(x, block_b=None):
    """Pallas TPU implementation of StatisticalPoolingLayer.forward.

    x: (B, T, D) array.  Returns (B, 2*D): concat(mean over T, unbiased std over T).
    """
    B, T, D = x.shape
    assert T >= 2, "unbiased std (ddof=1) requires at least 2 timesteps"

    itemsize = jnp.dtype(x.dtype).itemsize
    tc_chunk = min(T, 64)
    phys_vmem = _physical_vmem_bytes()

    if block_b is None:
        block_b = _pick_block_b(B, T, D, itemsize, tc_chunk, phys_vmem)
    block_b = max(1, min(block_b, B))

    grid_b = pl.cdiv(B, block_b)
    B_pad = grid_b * block_b
    x_in = x if B_pad == B else jnp.pad(x, ((0, B_pad - B), (0, 0), (0, 0)))

    # Explicit scoped-VMEM limit sized to the real footprint (+ headroom);
    # needed for >16 MiB (v5e default) / >32 MiB (v6e/v7x default) footprints.
    need = (2 * block_b * T * D * itemsize                # double-buffered input
            + 2 * block_b * 2 * D * itemsize              # double-buffered output
            + 3 * block_b * tc_chunk * D * 4)             # f32 chunk temporaries
    vmem_limit = int(min(0.9 * phys_vmem,
                         max(32 * 1024 * 1024, need + 8 * 1024 * 1024)))

    cost = pl.CostEstimate(
        flops=4 * B_pad * T * D,
        transcendentals=B_pad * D,
        bytes_accessed=(B_pad * T * D + B_pad * 2 * D) * itemsize,
    )

    out = pl.pallas_call(
        functools.partial(_stat_pool_kernel, tc_chunk=tc_chunk),
        out_shape=jax.ShapeDtypeStruct((B_pad, 2, D), x.dtype),
        grid_spec=pltpu.PrefetchScalarGridSpec(
            num_scalar_prefetch=0,
            grid=(grid_b,),
            in_specs=[pl.BlockSpec((block_b, T, D), lambda b: (b, 0, 0))],
            out_specs=pl.BlockSpec((block_b, 2, D), lambda b: (b, 0, 0)),
        ),
        compiler_params=pltpu.CompilerParams(
            dimension_semantics=("parallel",),
            vmem_limit_bytes=vmem_limit,
        ),
        cost_estimate=cost,
    )(x_in)

    out = out.reshape(B_pad, 2 * D)          # (B, 2, D) -> (B, 2D) == cat(dim=1)
    return out[:B] if B_pad != B else out


def _reference(x):
    """Pure-JAX reference mirroring the PyTorch forward."""
    mean = jnp.mean(x, axis=1)
    std = jnp.std(x, axis=1, ddof=1)         # torch.std default: unbiased
    return jnp.concatenate([mean, std], axis=1)


if __name__ == "__main__":
    key = jax.random.PRNGKey(0)

    # Case 1: aligned shapes (batch-blocked grid, 4 steps, lane-dense output).
    B, T, D = 16, 32, 128
    x = jax.random.normal(key, (B, T, D), jnp.float32)
    out = jax.block_until_ready(statistical_pooling(x))
    np.testing.assert_allclose(np.asarray(out), np.asarray(_reference(x)),
                               rtol=1e-5, atol=1e-5)

    # Case 2: awkward shapes (B not a multiple of the block, D not 128-aligned)
    # exercising the padding path and the (B, 2, D) output layout.
    B2, T2, D2 = 5, 10, 96
    x2 = jax.random.normal(jax.random.PRNGKey(1), (B2, T2, D2), jnp.float32)
    out2 = jax.block_until_ready(statistical_pooling(x2))
    np.testing.assert_allclose(np.asarray(out2), np.asarray(_reference(x2)),
                               rtol=1e-5, atol=1e-5)

    print("KERNEL_OK")
</pallas_src>

<mosaic_0001>
module attributes {stable_mosaic.version = 11 : i64} {
  func.func @_stat_pool_kernel(%arg0: i32, %arg1: memref<4x32x128xf32, #tpu.memory_space<vmem>>, %arg2: memref<4x2x128xf32, #tpu.memory_space<vmem>>) attributes {dimension_semantics = [#tpu.dimension_semantics<parallel>], iteration_bounds = array<i64: 4>, scalar_prefetch = 0 : i64, scratch_operands = 0 : i64, tpu.core_type = #tpu.core_type<tc>, window_params = [{transform_indices = @transform_0, window_bounds = array<i64: 4, 32, 128>}, {transform_indices = @transform_1, window_bounds = array<i64: 4, 2, 128>}]} {
    %cst = arith.constant 0.000000e+00 : f32
    %0 = vector.broadcast %cst : f32 to vector<4x128xf32>
    %c0 = arith.constant 0 : index
    %c0_0 = arith.constant 0 : index
    %c0_1 = arith.constant 0 : index
    %1 = vector.load %arg1[%c0, %c0_0, %c0_1] : memref<4x32x128xf32, #tpu.memory_space<vmem>>, vector<4x32x128xf32>
    %cst_2 = arith.constant dense<0.000000e+00> : vector<4x128xf32>
    %2 = vector.multi_reduction <add>, %1, %cst_2 [1] : vector<4x32x128xf32> to vector<4x128xf32>
    %3 = arith.addf %0, %2 : vector<4x128xf32>
    %cst_3 = arith.constant 3.125000e-02 : f32
    %4 = vector.broadcast %cst_3 : f32 to vector<4x128xf32>
    %5 = arith.mulf %3, %4 : vector<4x128xf32>
    %cst_4 = arith.constant 0.000000e+00 : f32
    %6 = vector.broadcast %cst_4 : f32 to vector<4x128xf32>
    %c0_5 = arith.constant 0 : index
    %c0_6 = arith.constant 0 : index
    %c0_7 = arith.constant 0 : index
    %7 = vector.load %arg1[%c0_5, %c0_6, %c0_7] : memref<4x32x128xf32, #tpu.memory_space<vmem>>, vector<4x32x128xf32>
    %8 = vector.shape_cast %5 : vector<4x128xf32> to vector<4x1x128xf32>
    %9 = vector.broadcast %8 : vector<4x1x128xf32> to vector<4x32x128xf32>
    %10 = arith.subf %7, %9 : vector<4x32x128xf32>
    %11 = arith.mulf %10, %10 : vector<4x32x128xf32>
    %cst_8 = arith.constant dense<0.000000e+00> : vector<4x128xf32>
    %12 = vector.multi_reduction <add>, %11, %cst_8 [1] : vector<4x32x128xf32> to vector<4x128xf32>
    %13 = arith.addf %6, %12 : vector<4x128xf32>
    %cst_9 = arith.constant 0.0322580636 : f32
    %14 = vector.broadcast %cst_9 : f32 to vector<4x128xf32>
    %15 = arith.mulf %13, %14 : vector<4x128xf32>
    %16 = math.sqrt %15 : vector<4x128xf32>
    %c0_10 = arith.constant 0 : index
    %c0_11 = arith.constant 0 : index
    %c0_12 = arith.constant 0 : index
    %17 = vector.load %arg2[%c0_10, %c0_11, %c0_12] : memref<4x2x128xf32, #tpu.memory_space<vmem>>, vector<4x1x128xf32>
    %18 = vector.shape_cast %17 : vector<4x1x128xf32> to vector<4x128xf32>
    %19 = vector.shape_cast %5 : vector<4x128xf32> to vector<4x1x128xf32>
    tpu.vector_store %arg2[%c0_10, %c0_11, %c0_12], %19 {strides = array<i32>} : memref<4x2x128xf32, #tpu.memory_space<vmem>>, vector<4x1x128xf32>,
    %c0_13 = arith.constant 0 : index
    %c1 = arith.constant 1 : index
    %c0_14 = arith.constant 0 : index
    %20 = vector.load %arg2[%c0_13, %c1, %c0_14] : memref<4x2x128xf32, #tpu.memory_space<vmem>>, vector<4x1x128xf32>
    %21 = vector.shape_cast %20 : vector<4x1x128xf32> to vector<4x128xf32>
    %22 = vector.shape_cast %16 : vector<4x128xf32> to vector<4x1x128xf32>
    tpu.vector_store %arg2[%c0_13, %c1, %c0_14], %22 {strides = array<i32>} : memref<4x2x128xf32, #tpu.memory_space<vmem>>, vector<4x1x128xf32>,
    return
  }
  func.func @transform_0(%arg0: i32) -> (i32, i32, i32) {
    %c0_i32 = arith.constant 0 : i32
    %c0_i32_0 = arith.constant 0 : i32
    %c0_i32_1 = arith.constant 0 : i32
    return %arg0, %c0_i32, %c0_i32_0 : i32, i32, i32
  }
  func.func @transform_1(%arg0: i32) -> (i32, i32, i32) {
    %c0_i32 = arith.constant 0 : i32
    %c0_i32_0 = arith.constant 0 : i32
    %c0_i32_1 = arith.constant 0 : i32
    return %arg0, %c0_i32, %c0_i32_0 : i32, i32, i32
  }
}

</mosaic_0001>

<bundles_post_ra>
// kernel: tpu_custom_call.1
= control target key start
LH: loop header
LB: loop body
LE: loop exit
PB: predicated region body
PF: predicated region fallthrough
CT: control target
= control target key end

     0   :  { %6 = vsyncpa [#allocation3], 0  ;;  %s779_s0 = inlined_call_operand.hbm [shape: f32[16,32,128], index: 0, kind: input, shape index: {}]   ;;  %s780_s1 = inlined_call_operand.hbm [shape: f32[16,2,128], index: 1, kind: output, shape index: {}]  }
   0x1   :  { %8 = vsyncpa [#allocation3 + $0x1], 0 }
   0x2   :  { %9 = vsyncpa [#allocation4], 0 }
   0x3   :  { %11 = vsyncpa [#allocation4 + $0x1], 0  ;;  %s583_s6 = smov 0   ;;  %s585_s7 = smov 0  }
   0x4   :  { %s587_s8 = smov 0   ;;  %s589_s9 = smov 0  }
   0x5 LB: > { %s604_s10 = sadd.s32 4294967295, %s565_s9   ;;  %s397_s11 = sadd.s32 4294967294, %s565_s9   ;;  %s565_s9 = sphi %s589_s9, %s794_s9   ;;  %s561_s8 = sphi %s587_s8, %s793_s8   ;;  %s557_s7 = sphi %s585_s7, %s792_s7   ;;  %s553_s6 = sphi %s583_s6, %s791_s6  }
   0x6   : > { %s608_s12 = sadd.s32 1, %s565_s9   ;;  %s24_s13 = sadd.s32 1, %s561_s8 }
   0x7   : > { %s21_s14 = ssub.s32 %s565_s9, %s608_s12  ;;  %p31_p0 = scmp.ne.s32.totalorder %s561_s8, %s557_s7 }
   0x8   : > { %p22_p1 = scmp.eq.s32.totalorder %s21_s14, 0  ;;  %p32_p2 = scmp.eq.s32.totalorder %s565_s9, 0 }
   0x9   : > { %p37_p3 = scmp.ne.s32.totalorder %s557_s7, %s553_s6  ;;  %p38_p4 = scmp.eq.s32.totalorder %s604_s10, 0 }
   0xa   : > { %s620_s15 = scalar_select %p22_p1, %s561_s8, %s24_s13  }
   0xb   : > { %p622_p5 = por %p32_p2, %p31_p0  ;;  %p626_p6 = por %p38_p4, %p37_p3 }
   0xc   : > { %p61_p7 = scmp.eq.s32.totalorder %s604_s10, 3  ;;  %p67_p8 = scmp.eq.s32.totalorder %s397_s11, 3 }
   0xd   : > { %s784_s17 = scalar_select %p626_p6, 1, 0 }
   0xe   : > { %p427_p9 = scmp.lt.s32.totalorder %s565_s9, 4  ;;  %p632_p10 = por %p61_p7, %p31_p0 }
   0xf   : > { %p636_p11 = por %p67_p8, %p37_p3  ;;  %s87_s20 = sand.u32 1, %s561_s8  }
  0x10   : > { %s785_s18 = scalar_select %p632_p10, 1, 0 }
  0x11   : > { %s786_s19 = scalar_select %p636_p11, 1, 0 }
  0x12   : > { %s413_s21 = sshll.u32 %s565_s9, 11  ;;  %s400_s22 = sshll.u32 %s87_s20, 7 }
  0x13   : > { %s645_s25 = scalar_lea.hbm %s779_s0, %s413_s21  ;;  %s91_s26 = scalar_lea.vmem [#allocation2], %s400_s22 }
  0x14   : > { %s99_s27 = sshll.u32 %s91_s26, 4  ;;  %p649_p12 = pnand %p427_p9, %p622_p5  ;;  %s653_s27 = int_to_ptr.vmem [resolvable:$true] %s99_s27 }
  0x15   : > { %s655_s29 = scalar_lea.sflag [#allocation3], %s87_s20  ;;  %s473_s30 = scalar_lea.hbm %s645_s25, 2048 }
  0x16   : > { %p474_p13 = scmp.ne.s32.totalorder %s645_s25, %s473_s30  ;;  %p475_p0 = pneg %p649_p12 }
  0x17   : > { %s478_s4 = scalar_lea.hbm %s779_s0, 8192  ;;  %p479_p3 = scmp.lt.s32.totalorder %s645_s25, %s779_s0 }
  0x18   : > { %p476_p1 = pnand %p475_p0, %p474_p13  ;;  %p480_p4 = scmp.lt.s32.totalorder %s478_s4, %s473_s30 }
  0x1a   : > { %p477_p2 = pneg %p476_p1  ;;  %p481_p5 = por %p480_p4, %p479_p3 }
  0x1c   : > { %p482_p7 = pnand %p481_p5, %p477_p2 }
  0x1e   : > { %485 = shalt.err (!%p482_p7)
}
  0x1f   : > { %s486_s13 = scalar_lea.vmem %s653_s27, 2048  ;;  %s567_s14 = smov [#allocation2]  }
  0x20   : > { %p487_p8 = scmp.ne.s32.totalorder %s653_s27, %s486_s13  ;;  %s491_s16 = sshll.u32 %s567_s14, 4  ;;  %s492_s16 = int_to_ptr.vmem [resolvable:$false] %s491_s16 }
  0x21   : > { %s493_s20 = scalar_lea.vmem %s492_s16, 4096  ;;  %p494_p1 = scmp.lt.s32.totalorder %s653_s27, %s492_s16 }
  0x22   : > { %p489_p9 = pnand %p487_p8, %p475_p0  ;;  %p495_p11 = scmp.lt.s32.totalorder %s493_s20, %s486_s13 }
  0x24   : > { %p490_p13 = pneg %p489_p9  ;;  %p496_p10 = por %p495_p11, %p494_p1 }
  0x26   : > { %p497_p6 = pnand %p496_p10, %p490_p13 }
  0x28   : > { %500 = shalt.err (!%p497_p6)
}
  0x29   : > { %s568_s21 = smov 128   ;;  %s569_s22 = smov 8  }
  0x2a   : > { %422 = dma.hbm_to_vmem [thread:$0]  (!%p649_p12), %s645_s25, 2048, %s653_s27, %s655_s29, %s568_s21, %s568_s21, %s569_s22  }
  0x2b   : > { %p404_p0 = scmp.ge.s32.totalorder %s565_s9, 1  ;;  %p107_p2 = scmp.lt.s32.totalorder %s565_s9, 5 }
  0x2d   : > { %p108_p3 = pnand %p404_p0, %p107_p2 }
  0x2e   : > { %s679_s23 = sand.u32 (!%p108_p3), 1, %s557_s7   ;;  %p788_p6 = scmp.ne.s32.totalorder (!%p108_p3), %s784_s17, 0 }
  0x2f   : > { %111 = sbr.rel (%p108_p3) target bundleno = 138 (0x8a), region = 24  ;;  %s405_s24 = sshll.u32 (!%p108_p3), %s679_s23, 7 }
  0x30   : > { %s114_s26 = scalar_lea.sflag (!%p108_p3), [#allocation3], %s679_s23  ;;  %s117_s30 = scalar_lea.vmem (!%p108_p3), [#allocation2], %s405_s24 }
  0x34   : > { %544 = dma.done.wait (%p788_p6), %s114_s26, 2048  }
  0x35   : > { %546 = vsyncadd (%p788_p6), %s114_s26, 4294965248  ;;  %v138_v0 = vld [vmem:[%s117_s30] sm:$0xff]  ;;  %v139_v1 = vld [vmem:[%s117_s30 + $0x8] sm:$0xff]  ;;  %s406_s17 = sshll.u32 %s679_s23, 3  ;;  %s414_s28 = sshll.u32 %s604_s10, 7 }
  0x36   : > { %v140_v2 = vld [vmem:[%s117_s30 + $0x10] sm:$0xff]  ;;  %v154_v3 = vadd.f32 %v139_v1, %v138_v0  ;;  %v142_v4 = vld [vmem:[%s117_s30 + $0x20] sm:$0xff]  ;;  %v143_v5 = vld [vmem:[%s117_s30 + $0x28] sm:$0xff]  ;;  %s712_s25 = scalar_lea.vmem [#allocation5], %s406_s17  ;;  %s736_s3 = scalar_lea.hbm %s780_s1, %s414_s28 }
  0x37   : > { %v141_v6 = vld [vmem:[%s117_s30 + $0x18] sm:$0xff]  ;;  %v144_v7 = vld [vmem:[%s117_s30 + $0x30] sm:$0xff]  ;;  %v163_v8 = vadd.f32 %v143_v5, %v142_v4  ;;  %v687_v9 = vld [vmem:[%s117_s30 + $0x40] sm:$0xff]  ;;  %s324_s27 = sshll.u32 %s712_s25, 4  ;;  %s311_s10 = scalar_lea.sflag [#allocation4], %s679_s23  ;;  %s730_s27 = int_to_ptr.vmem [resolvable:$true] %s324_s27 }
  0x38   : > { %v155_v10 = vadd.f32 %v154_v3, %v140_v2  ;;  %v145_v11 = vld [vmem:[%s117_s30 + $0x38] sm:$0xff]  ;;  %v689_v12 = vld [vmem:[%s117_s30 + $0x48] sm:$0xff]  ;;  %v691_v13 = vld [vmem:[%s117_s30 + $0x50] sm:$0xff]  ;;  %s501_s4 = scalar_lea.vmem %s730_s27, 128  ;;  %p789_p11 = scmp.ne.s32.totalorder %s785_s18, 0 }
  0x39   : > { %v164_v14 = vadd.f32 %v163_v8, %v144_v7  ;;  %v172_v15 = vadd.f32 %v689_v12, %v687_v9  ;;  %v695_v16 = vld [vmem:[%s117_s30 + $0x60] sm:$0xff]  ;;  %v697_v17 = vld [vmem:[%s117_s30 + $0x68] sm:$0xff]  ;;  %v699_v18 = vld [vmem:[%s117_s30 + $0x70] sm:$0xff]  ;;  %p502_p10 = scmp.ne.s32.totalorder %s730_s27, %s501_s4  ;;  %s570_s5 = smov [#allocation5]  }
  0x3a   : > { %v156_v19 = vadd.f32 %v155_v10, %v141_v6  ;;  %v701_v20 = vld [vmem:[%s117_s30 + $0x58] sm:$0xff]  ;;  %v181_v21 = vadd.f32 %v697_v17, %v695_v16  ;;  %s505_s11 = sshll.u32 %s570_s5, 4  ;;  %s506_s11 = int_to_ptr.vmem [resolvable:$false] %s505_s11 }
  0x3b   : > { %v165_v22 = vadd.f32 %v164_v14, %v145_v11  ;;  %v173_v23 = vadd.f32 %v172_v15, %v691_v13  ;;  %v706_v24 = vld [vmem:[%s117_s30 + $0x78] sm:$0xff]  ;;  %p503_p12 = pnand %p502_p10, %p789_p11  ;;  %s507_s13 = scalar_lea.vmem %s506_s11, 256 }
  0x3c   : > { %v157_v25 = vrot.slane %v156_v19, 4  ;;  %v182_v26 = vadd.f32 %v181_v21, %v699_v18  ;;  %p508_p5 = scmp.lt.s32.totalorder %s730_s27, %s506_s11  ;;  %p509_p7 = scmp.lt.s32.totalorder %s507_s13, %s501_s4 }
  0x3d   : > { %v166_v27 = vrot.slane %v165_v22, 4  ;;  %v174_v28 = vadd.f32 %v173_v23, %v701_v20  ;;  %p504_p4 = pneg %p503_p12 }
  0x3e   : > { %v158_v29 = vadd.f32 %v157_v25, %v156_v19  ;;  %v183_v30 = vadd.f32 %v182_v26, %v706_v24  ;;  %p510_p8 = por %p509_p7, %p508_p5 }
  0x3f   : > { %v167_v31 = vadd.f32 %v166_v27, %v165_v22  ;;  %v175_v32 = vrot.slane %v174_v28, 4 }
  0x40   : > { %v159_v33 = vrot.slane %v158_v29, 2  ;;  %v184_v34 = vrot.slane %v183_v30, 4  ;;  %p511_p9 = pnand %p510_p8, %p504_p4 }
  0x41   : > { %v168_v35 = vrot.slane %v167_v31, 2  ;;  %v176_v36 = vadd.f32 %v175_v32, %v174_v28 }
  0x42   : > { %v160_v37 = vadd.f32 %v159_v33, %v158_v29  ;;  %v185_v38 = vadd.f32 %v184_v34, %v183_v30 }
  0x43   : > { %v169_v39 = vadd.f32 %v168_v35, %v167_v31  ;;  %v177_v40 = vrot.slane %v176_v36, 2 }
  0x44   : > { %v161_v41 = vrot.slane %v160_v37, 1  ;;  %v186_v42 = vrot.slane %v185_v38, 2 }
  0x45   : > { %v170_v43 = vrot.slane %v169_v39, 1  ;;  %v178_v44 = vadd.f32 %v177_v40, %v176_v36 }
  0x46   : > { %v162_v45 = vadd.f32 %v161_v41, %v160_v37  ;;  %v187_v46 = vadd.f32 %v186_v42, %v185_v38 }
  0x47   : > { %v171_v47 = vadd.f32 %v170_v43, %v169_v39  ;;  %v179_v48 = vrot.slane %v178_v44, 1 }
  0x48   : > { %v194_v49 = vmul.f32 0.03125, %v162_v45  ;;  %v188_v52 = vrot.slane %v187_v46, 1 }
  0x49   : > { %v195_v50 = vmul.f32 0.03125, %v171_v47  ;;  %v180_v51 = vadd.f32 %v179_v48, %v178_v44 }
  0x4a   : > { %v198_v53 = vsub.f32 %v138_v0, %v194_v49  ;;  %v199_v54 = vsub.f32 %v139_v1, %v194_v49  ;;  %v200_v55 = vsub.f32 %v140_v2, %v194_v49  ;;  %v201_v56 = vsub.f32 %v141_v6, %v194_v49  ;;  %302 = vst [vmem:[%s712_s25] sm:$0x1] %v194_v49 }
  0x4b   : > { %v202_v57 = vsub.f32 %v142_v4, %v195_v50  ;;  %v203_v58 = vsub.f32 %v143_v5, %v195_v50  ;;  %v204_v59 = vsub.f32 %v144_v7, %v195_v50  ;;  %v205_v60 = vsub.f32 %v145_v11, %v195_v50  ;;  %303 = vst [vmem:[%s712_s25 + $0x2] sm:$0x1] %v195_v50 }
  0x4c   : > { %v214_v61 = vmul.f32 %v198_v53, %v198_v53  ;;  %v215_v62 = vmul.f32 %v199_v54, %v199_v54  ;;  %v216_v63 = vmul.f32 %v200_v55, %v200_v55  ;;  %v217_v1 = vmul.f32 %v201_v56, %v201_v56 }
  0x4d   : > { %v218_v3 = vmul.f32 %v202_v57, %v202_v57  ;;  %v219_v8 = vmul.f32 %v203_v58, %v203_v58  ;;  %v220_v0 = vmul.f32 %v204_v59, %v204_v59  ;;  %v196_v6 = vmul.f32 0.03125, %v180_v51 }
  0x4e   : > { %v230_v2 = vadd.f32 %v215_v62, %v214_v61  ;;  %v189_v10 = vadd.f32 %v188_v52, %v187_v46  ;;  %v221_v14 = vmul.f32 %v205_v60, %v205_v60 }
  0x4f   : > { %v239_v15 = vadd.f32 %v219_v8, %v218_v3  ;;  %v206_v4 = vsub.f32 %v687_v9, %v196_v6  ;;  %v207_v5 = vsub.f32 %v689_v12, %v196_v6  ;;  %v208_v7 = vsub.f32 %v691_v13, %v196_v6  ;;  %304 = vst [vmem:[%s712_s25 + $0x4] sm:$0x1] %v196_v6 }
  0x50   : > { %v231_v19 = vadd.f32 %v230_v2, %v216_v63  ;;  %v209_v21 = vsub.f32 %v701_v20, %v196_v6  ;;  %v197_v22 = vmul.f32 0.03125, %v189_v10 }
  0x51   : > { %v240_v11 = vadd.f32 %v239_v15, %v220_v0  ;;  %v222_v25 = vmul.f32 %v206_v4, %v206_v4  ;;  %v223_v26 = vmul.f32 %v207_v5, %v207_v5  ;;  %v224_v27 = vmul.f32 %v208_v7, %v208_v7 }
  0x52   : > { %v232_v23 = vadd.f32 %v231_v19, %v217_v1  ;;  %v225_v29 = vmul.f32 %v209_v21, %v209_v21  ;;  %v210_v30 = vsub.f32 %v695_v16, %v197_v22  ;;  %v211_v31 = vsub.f32 %v697_v17, %v197_v22  ;;  %305 = vst [vmem:[%s712_s25 + $0x6] sm:$0x1] %v197_v22 }
  0x53   : > { %v241_v28 = vadd.f32 %v240_v11, %v221_v14  ;;  %v248_v12 = vadd.f32 %v223_v26, %v222_v25  ;;  %v212_v13 = vsub.f32 %v699_v18, %v197_v22  ;;  %v213_v32 = vsub.f32 %v706_v24, %v197_v22 }
  0x54   : > { %v233_v9 = vrot.slane %v232_v23, 4  ;;  %v226_v20 = vmul.f32 %v210_v30, %v210_v30  ;;  %v227_v34 = vmul.f32 %v211_v31, %v211_v31 }
  0x55   : > { %v242_v33 = vrot.slane %v241_v28, 4  ;;  %v249_v36 = vadd.f32 %v248_v12, %v224_v27  ;;  %v228_v37 = vmul.f32 %v212_v13, %v212_v13  ;;  %v229_v39 = vmul.f32 %v213_v32, %v213_v32 }
  0x56   : > { %v234_v35 = vadd.f32 %v233_v9, %v232_v23  ;;  %v257_v40 = vadd.f32 %v227_v34, %v226_v20 }
  0x57   : > { %v243_v38 = vadd.f32 %v242_v33, %v241_v28  ;;  %v250_v41 = vadd.f32 %v249_v36, %v225_v29 }
  0x58   : > { %v235_v16 = vrot.slane %v234_v35, 2  ;;  %v258_v42 = vadd.f32 %v257_v40, %v228_v37 }
  0x59   : > { %v244_v17 = vrot.slane %v243_v38, 2  ;;  %v251_v43 = vrot.slane %v250_v41, 4 }
  0x5a   : > { %v236_v44 = vadd.f32 %v235_v16, %v234_v35  ;;  %v259_v45 = vadd.f32 %v258_v42, %v229_v39 }
  0x5b   : > { %v245_v46 = vadd.f32 %v244_v17, %v243_v38  ;;  %v252_v18 = vadd.f32 %v251_v43, %v250_v41 }
  0x5c   : > { %v237_v47 = vrot.slane %v236_v44, 1  ;;  %v260_v24 = vrot.slane %v259_v45, 4 }
  0x5d   : > { %v246_v48 = vrot.slane %v245_v46, 1  ;;  %v253_v50 = vrot.slane %v252_v18, 2 }
  0x5e   : > { %v238_v49 = vadd.f32 %v237_v47, %v236_v44  ;;  %v261_v51 = vadd.f32 %v260_v24, %v259_v45 }
  0x5f   : > { %v247_v52 = vadd.f32 %v246_v48, %v245_v46  ;;  %v254_v54 = vadd.f32 %v253_v50, %v252_v18 }
  0x60   : > { %v270_v53 = vmul.f32 0.032258064, %v238_v49  ;;  %v262_v56 = vrot.slane %v261_v51, 2 }
  0x61   : > { %v271_v55 = vmul.f32 0.032258064, %v247_v52  ;;  %v255_v57 = vrot.slane %v254_v54, 1 }
  0x62   : > { %465 = vrsqrt.f32 %v270_v53  ;;  %v263_v58 = vadd.f32 %v262_v56, %v261_v51  ;;  %vm276_vm0 = vcmp.eq.f32.partialorder %v270_v53, inf  ;;  %v279_v8 = vand.u32 2147483648, %v270_v53 }
  0x63   : > { %467 = vrsqrt.f32 %v271_v55  ;;  %v256_v59 = vadd.f32 %v255_v57, %v254_v54  ;;  %vm278_vm1 = vcmp.eq.f32.partialorder %v270_v53, 0.0  ;;  %vm283_vm2 = vcmp.eq.f32.partialorder %v271_v55, inf }
  0x64   : > { %v264_v60 = vrot.slane %v263_v58, 1  ;;  %v286_v2 = vand.u32 2147483648, %v271_v55  ;;  %vm285_vm3 = vcmp.eq.f32.partialorder %v271_v55, 0.0 }
  0x65   : > { %v272_v61 = vmul.f32 0.032258064, %v256_v59 }
  0x66   : > { %v265_v62 = vadd.f32 %v264_v60, %v263_v58 }
  0x67   : > { %469 = vrsqrt.f32 %v272_v61  ;;  %vm290_vm4 = vcmp.eq.f32.partialorder %v272_v61, inf  ;;  %v293_v5 = vand.u32 2147483648, %v272_v61  ;;  %vm292_vm5 = vcmp.eq.f32.partialorder %v272_v61, 0.0 }
  0x68   : > { %v273_v63 = vmul.f32 0.032258064, %v265_v62 }
  0x6a   : > { %471 = vrsqrt.f32 %v273_v63  ;;  %vm297_vm6 = vcmp.eq.f32.partialorder %v273_v63, inf  ;;  %v300_v22 = vand.u32 2147483648, %v273_v63  ;;  %vm299_vm7 = vcmp.eq.f32.partialorder %v273_v63, 0.0 }
  0x6f   : > { %v466_v3 = vpop.eup %465 }
  0x70   : > { %v468_v0 = vpop.eup %467  ;;  %v275_v1 = vmul.f32 %v466_v3, %v270_v53 }
  0x71   : > { %v282_v6 = vmul.f32 %v468_v0, %v271_v55 }
  0x72   : > { %v277_v10 = vsel %vm276_vm0, %v270_v53, %v275_v1 }
  0x73   : > { %v280_v14 = vsel %vm278_vm1, %v279_v8, %v277_v10  ;;  %v284_v15 = vsel %vm283_vm2, %v271_v55, %v282_v6 }
  0x74   : > { %306 = vst [vmem:[%s712_s25 + $0x1] sm:$0x1] %v280_v14  ;;  %v287_v19 = vsel %vm285_vm3, %v286_v2, %v284_v15  ;;  %v470_v4 = vpop.eup %469 }
  0x75   : > { %307 = vst [vmem:[%s712_s25 + $0x3] sm:$0x1] %v287_v19  ;;  %v289_v7 = vmul.f32 %v470_v4, %v272_v61 }
  0x77   : > { %v472_v11 = vpop.eup %471  ;;  %v291_v21 = vsel %vm290_vm4, %v272_v61, %v289_v7 }
  0x78   : > { %v294_v23 = vsel %vm292_vm5, %v293_v5, %v291_v21  ;;  %v296_v25 = vmul.f32 %v472_v11, %v273_v63 }
  0x79   : > { %308 = vst [vmem:[%s712_s25 + $0x5] sm:$0x1] %v294_v23 }
  0x7a   : > { %v298_v26 = vsel %vm297_vm6, %v273_v63, %v296_v25 }
  0x7b   : > { %v301_v27 = vsel %vm299_vm7, %v300_v22, %v298_v26 }
  0x7c   : > { %309 = vst [vmem:[%s712_s25 + $0x7] sm:$0x1] %v301_v27 }
  0x7d   : > { %514 = shalt.err (!%p511_p9)
}
  0x7e   : > { %s515_s14 = scalar_lea.hbm %s736_s3, 128  ;;  %s519_s21 = scalar_lea.hbm %s780_s1, 512 }
  0x7f   : > { %p516_p13 = scmp.ne.s32.totalorder %s736_s3, %s515_s14  ;;  %p520_p2 = scmp.lt.s32.totalorder %s736_s3, %s780_s1 }
  0x80   : > { %p521_p3 = scmp.lt.s32.totalorder %s519_s21, %s515_s14 }
  0x81   : > { %p517_p1 = pnand %p516_p13, %p789_p11 }
  0x82   : > { %p522_p6 = por %p521_p3, %p520_p2 }
  0x83   : > { %p518_p0 = pneg %p517_p1 }
  0x85   : > { %p523_p10 = pnand %p522_p6, %p518_p0 }
  0x87   : > { %526 = shalt.err (!%p523_p10)
}
  0x88   : > { %s571_s26 = smov 32   ;;  %s572_s30 = smov 2  }
  0x89   : > { %417 = dma.vmem_to_hbm [thread:$0]  (%p789_p11), %s730_s27, 128, %s736_s3, %s311_s10, %s571_s26, %s571_s26, %s572_s30  }
  0x8a PF: > { %p428_p12 = scmp.ge.s32.totalorder %s565_s9, 2  ;;  %s339_s17 = sand.u32 1, %s553_s6  }
  0x8b   : > { %p790_p4 = scmp.ne.s32.totalorder %s786_s19, 0  ;;  %s340_s25 = scalar_lea.sflag [#allocation4], %s339_s17 }
  0x8d   : > { %p424_p5 = pnand %p428_p12, %p790_p4 }
  0x8f   : > { %p425_p7 = pneg %p424_p5 }
  0x91   : > { %548 = dma.done.wait (%p425_p7), %s340_s25, 128  }
  0x92   : > { %550 = vsyncadd (%p425_p7), %s340_s25, 4294967168  ;;  %p14_p8 = scmp.ge.s32.totalorder %s608_s12, 6   ;;  %s791_s6 = smov %s557_s7 }
  0x93   : > { %s792_s7 = smov %s561_s8  ;;  %s793_s8 = smov %s620_s15 }
  0x94   : > { %s794_s9 = smov %s608_s12  ;;  %16 = sbr.rel (!%p14_p8) target bundleno = 5 (0x5), region = 69 }
  0x99   :  { %345 = vsyncpa [#allocation3], 1 }
  0x9a   :  { %347 = vsyncpa [#allocation3 + $0x1], 1 }
  0x9b   :  { %348 = vsyncpa [#allocation4], 1 }
  0x9c   :  { %350 = vsyncpa [#allocation4 + $0x1], 1 }

</bundles_post_ra>
